<compile_context>
chip_gen: v5e
topology: v5e:2x2
jax: 0.10.0
libtpu: 0.0.40
codegen_flags: <defaults>
</compile_context>

<pallas_src>
import jax
import jax.numpy as jnp
from jax.experimental import pallas as pl
from jax.experimental.pallas import tpu as pltpu


def _ffn_kernel(x_ref, w1_ref, b1_ref, w_ref, b_ref, o_ref):
    f32 = jnp.float32
    x = x_ref[...]                                        # (tile_m, 91) f32

    # Stage 0: 91 -> 64, row-major. Small weight is the stationary operand.
    h = jnp.dot(x, w1_ref[...], preferred_element_type=f32) + b1_ref[...]
    h = jnp.maximum(h, 0.0)                               # (tile_m, 64)

    # Stage A: 64 -> 16, fused [linear ; conv], output in transposed space.
    # NT contraction (flash-attention pattern): za[o, m] = sum_k wfa[o,k]*h[m,k].
    wfa = w_ref[0:32, :]                                  # (32, 64)
    za = jax.lax.dot_general(wfa, h, (((1,), (1,)), ((), ())),
                             preferred_element_type=f32)
    za = za + b_ref[0:32, :]                              # (32, tile_m)
    hT = jnp.maximum(jnp.maximum(za[0:16, :], 0.0) + za[16:32, :], 0.0)   # (16, tile_m)

    # Stage B: 16 -> 4 (output channels padded to 8; pad rows are exactly 0).
    wfb = w_ref[32:48, 0:16]                              # (16, 16)
    zb = jnp.dot(wfb, hT, preferred_element_type=f32) + b_ref[32:48, :]
    hT = jnp.maximum(jnp.maximum(zb[0:8, :], 0.0) + zb[8:16, :], 0.0)     # (8, tile_m)

    # Stage C: 4 -> 1 (padded to 8; only row 0 is live).
    wfc = w_ref[48:64, 0:8]                               # (16, 8)
    zc = jnp.dot(wfc, hT, preferred_element_type=f32) + b_ref[48:64, :]
    out = jnp.maximum(jnp.maximum(zc[0:8, :], 0.0) + zc[8:16, :], 0.0)    # (8, tile_m)

    # Rows 1..7 are exactly zero (zero pad weights + zero pad biases), so the
    # sublane reduction yields the live row as a lane-dense (1, tile_m) vector.
    o_ref[...] = jnp.sum(out, axis=0, keepdims=True)[None].astype(o_ref.dtype)


def pack_params(params):
    """One-time packing of the 14 PyTorch-layout params (call at model load).

    Returns (w1, b1, wpack, bpack):
      w1    (91, 64)  stage-0 weight (in, out)
      b1    (1, 64)   stage-0 bias
      wpack (64, 64)  [wfa(32,64) ; wfb(16,16)pad ; wfc(16,8)pad], transposed
                      per-stage fused [linear ; conv] weights, out channels
                      padded to multiples of 8 with zero rows
      bpack (64, 1)   matching fused biases (zero in pad rows)
    """
    (w1, b1, wl0, bl0, wc0, bc0,
     wl1, bl1, wc1, bc1, wl2, bl2, wc2, bc2) = params
    f32 = jnp.float32

    w1p = w1.astype(f32)                                  # (91, 64)
    b1p = b1.reshape(1, 64).astype(f32)

    def transposed_padded(w, b, out_pad, in_pad):
        # w: (in, out) -> (out_pad, in_pad) with w^T in the top-left corner.
        din, dout = w.shape
        wt = jnp.zeros((out_pad, in_pad), f32).at[:dout, :din].set(w.T.astype(f32))
        bt = jnp.zeros((out_pad,), f32).at[:dout].set(b.reshape(-1).astype(f32))
        return wt, bt

    wla, bla = transposed_padded(wl0, bl0, 16, 64)
    wca, bca = transposed_padded(wc0, bc0, 16, 64)
    wlb, blb = transposed_padded(wl1, bl1, 8, 16)
    wcb, bcb = transposed_padded(wc1, bc1, 8, 16)
    wlc, blc = transposed_padded(wl2, bl2, 8, 8)
    wcc, bcc = transposed_padded(wc2, bc2, 8, 8)

    wfa = jnp.concatenate([wla, wca], axis=0)             # (32, 64)
    wfb = jnp.concatenate([wlb, wcb], axis=0)             # (16, 16)
    wfc = jnp.concatenate([wlc, wcc], axis=0)             # (16, 8)

    def pad_cols(w, cols=64):
        return jnp.pad(w, ((0, 0), (0, cols - w.shape[1])))

    wpack = jnp.concatenate([wfa, pad_cols(wfb), pad_cols(wfc)], axis=0)   # (64, 64)
    bpack = jnp.concatenate([bla, bca, blb, bcb, blc, bcc]).reshape(64, 1)  # (64, 1)
    return w1p, b1p, wpack, bpack


def feedforward_pallas(x, packed, *, tile_m=4096):
    """x: (B, L, 91) float32 -> (B, L, 1) float32.

    packed: output of pack_params (hoisted out of the per-call path).
    tile_m: rows of the flattened B*L axis per grid step. Sweep 2048-4096 on
    v5e/v6e, 4096-8192 on v7x (keep the double-buffered input tile well under
    v7x's 64 MiB VMEM and keep n_tiles >= ~4 so both v7x TensorCores work).
    """
    assert tile_m % 8 == 0
    w1p, b1p, wpack, bpack = packed

    B, L, F_in = x.shape
    assert F_in == 91
    M = B * L
    x2d = x.reshape(M, F_in).astype(jnp.float32)

    # Degenerate tiny-input case only (block rows must be a multiple of 8 and
    # must not exceed the array): pad to 8 rows. No-op for any real workload.
    if M < 8:
        x2d = jnp.pad(x2d, ((0, 8 - M), (0, 0)))
    rows = x2d.shape[0]

    # Row tile: clamp to the array so no full-array jnp.pad copy is needed;
    # Pallas masks the ragged last block (garbage rows only produce garbage
    # outputs past M, which are sliced off below).
    tile_rows = min(tile_m, (rows // 8) * 8)
    n_tiles = pl.cdiv(rows, tile_rows)

    out = pl.pallas_call(
        _ffn_kernel,
        out_shape=jax.ShapeDtypeStruct((n_tiles, 1, tile_rows), jnp.float32),
        grid_spec=pltpu.PrefetchScalarGridSpec(
            num_scalar_prefetch=0,
            grid=(n_tiles,),
            in_specs=[
                # Raw 91-wide row tile: 91 == full last dim, so the BlockSpec
                # is legal and the HBM read stays at 364 B/row.
                pl.BlockSpec((tile_rows, 91), lambda i: (i, 0)),
                pl.BlockSpec((91, 64), lambda i: (0, 0)),   # w1    (fetched once)
                pl.BlockSpec((1, 64), lambda i: (0, 0)),    # b1    (fetched once)
                pl.BlockSpec((64, 64), lambda i: (0, 0)),   # wpack (fetched once)
                pl.BlockSpec((64, 1), lambda i: (0, 0)),    # bpack (fetched once)
            ],
            out_specs=pl.BlockSpec((1, 1, tile_rows), lambda i: (i, 0, 0)),  # lane-dense
        ),
        compiler_params=pltpu.CompilerParams(
            # Row-parallel grid: shards across the 2 TensorCores on v7x.
            dimension_semantics=("parallel",),
            # Headroom for tile_m sweeps; stays below v7x's 64 MiB physical
            # VMEM. Usage at tile_m=4096 is only a few MiB double-buffered.
            vmem_limit_bytes=48 * 1024 * 1024,
        ),
    )(x2d, w1p, b1p, wpack, bpack)

    return out.reshape(n_tiles * tile_rows)[:M].reshape(B, L, 1)


def init_params(key):
    """Deterministic parameter init mirroring the PyTorch module shapes.

    Weights stored transposed as (in, out); Conv1d kernel_size=1 weights
    (out, in, 1) are squeezed+transposed to (in, out). Biases are (1, out).
    """
    dims = [(91, 64), (64, 16), (16, 4), (4, 1)]
    keys = jax.random.split(key, 16)
    k = iter(keys)

    def lin(din, dout):
        bound = 1.0 / jnp.sqrt(din)
        w = jax.random.uniform(next(k), (din, dout), jnp.float32, -bound, bound)
        b = jax.random.uniform(next(k), (1, dout), jnp.float32, -bound, bound)
        return w, b

    w1, b1 = lin(*dims[0])
    wl0, bl0 = lin(*dims[1])
    wc0, bc0 = lin(*dims[1])
    wl1, bl1 = lin(*dims[2])
    wc1, bc1 = lin(*dims[2])
    wl2, bl2 = lin(*dims[3])
    wc2, bc2 = lin(*dims[3])
    return (w1, b1, wl0, bl0, wc0, bc0, wl1, bl1, wc1, bc1, wl2, bl2, wc2, bc2)


def feedforward_ref(x, params):
    (w1, b1, wl0, bl0, wc0, bc0, wl1, bl1, wc1, bc1, wl2, bl2, wc2, bc2) = params
    h = jax.nn.relu(x @ w1 + b1)
    for (wl, bl, wc, bc) in [(wl0, bl0, wc0, bc0),
                             (wl1, bl1, wc1, bc1),
                             (wl2, bl2, wc2, bc2)]:
        x1 = jax.nn.relu(h @ wl + bl)
        x2 = h @ wc + bc
        h = jax.nn.relu(x1 + x2)
    return h


if __name__ == "__main__":
    key = jax.random.PRNGKey(0)
    kx, kp = jax.random.split(key)

    B, L, F = 2, 8, 91
    x = jax.random.normal(kx, (B, L, F), jnp.float32)
    params = init_params(kp)

    # Packing happens once, outside the forward path.
    packed = pack_params(params)

    fwd = jax.jit(feedforward_pallas, static_argnames=("tile_m",))
    out = fwd(x, packed)
    out = jax.block_until_ready(out)

    ref = feedforward_ref(x, params)
    assert out.shape == (B, L, 1), out.shape
    max_err = float(jnp.max(jnp.abs(out - ref)))
    assert max_err < 1e-4, max_err

    print("KERNEL_OK")
</pallas_src>

<mosaic_0001>
module attributes {stable_mosaic.version = 11 : i64} {
  func.func @_ffn_kernel(%arg0: i32, %arg1: memref<16x91xf32, #tpu.memory_space<vmem>>, %arg2: memref<91x64xf32, #tpu.memory_space<vmem>>, %arg3: memref<1x64xf32, #tpu.memory_space<vmem>>, %arg4: memref<64x64xf32, #tpu.memory_space<vmem>>, %arg5: memref<64x1xf32, #tpu.memory_space<vmem>>, %arg6: memref<1x1x16xf32, #tpu.memory_space<vmem>>) attributes {dimension_semantics = [#tpu.dimension_semantics<parallel>], iteration_bounds = array<i64: 1>, scalar_prefetch = 0 : i64, scratch_operands = 0 : i64, tpu.core_type = #tpu.core_type<tc>, window_params = [{transform_indices = @transform_0, window_bounds = array<i64: 16, 91>}, {pipeline_mode = #tpu.pipeline_mode<synchronous>, transform_indices = @transform_1, window_bounds = array<i64: 91, 64>}, {pipeline_mode = #tpu.pipeline_mode<synchronous>, transform_indices = @transform_2, window_bounds = array<i64: 1, 64>}, {pipeline_mode = #tpu.pipeline_mode<synchronous>, transform_indices = @transform_3, window_bounds = array<i64: 64, 64>}, {pipeline_mode = #tpu.pipeline_mode<synchronous>, transform_indices = @transform_4, window_bounds = array<i64: 64, 1>}, {transform_indices = @transform_5, window_bounds = array<i64: 1, 1, 16>}]} {
    %c0 = arith.constant 0 : index
    %c0_0 = arith.constant 0 : index
    %0 = vector.load %arg1[%c0, %c0_0] : memref<16x91xf32, #tpu.memory_space<vmem>>, vector<16x91xf32>
    %c0_1 = arith.constant 0 : index
    %c0_2 = arith.constant 0 : index
    %1 = vector.load %arg2[%c0_1, %c0_2] : memref<91x64xf32, #tpu.memory_space<vmem>>, vector<91x64xf32>
    %cst = arith.constant dense<0.000000e+00> : vector<16x64xf32>
    %2 = tpu.matmul %0, %1, %cst {dimension_numbers = #tpu.dot_dimension_numbers<[1], [0], [0], [1], [0, 0, 1, 1], [], []>} : vector<16x91xf32>, vector<91x64xf32>, vector<16x64xf32> -> vector<16x64xf32>
    %c0_3 = arith.constant 0 : index
    %c0_4 = arith.constant 0 : index
    %3 = vector.load %arg3[%c0_3, %c0_4] : memref<1x64xf32, #tpu.memory_space<vmem>>, vector<1x64xf32>
    %4 = vector.broadcast %3 : vector<1x64xf32> to vector<16x64xf32>
    %5 = arith.addf %2, %4 : vector<16x64xf32>
    %cst_5 = arith.constant 0.000000e+00 : f32
    %6 = vector.broadcast %cst_5 : f32 to vector<16x64xf32>
    %7 = arith.maximumf %5, %6 : vector<16x64xf32>
    %c0_6 = arith.constant 0 : index
    %c0_7 = arith.constant 0 : index
    %8 = vector.load %arg4[%c0_6, %c0_7] : memref<64x64xf32, #tpu.memory_space<vmem>>, vector<32x64xf32>
    %cst_8 = arith.constant dense<0.000000e+00> : vector<32x16xf32>
    %9 = tpu.matmul %8, %7, %cst_8 {dimension_numbers = #tpu.dot_dimension_numbers<[1], [1], [0], [0], [0, 0, 1, 0], [], []>} : vector<32x64xf32>, vector<16x64xf32>, vector<32x16xf32> -> vector<32x16xf32>
    %c0_9 = arith.constant 0 : index
    %c0_10 = arith.constant 0 : index
    %10 = vector.load %arg5[%c0_9, %c0_10] : memref<64x1xf32, #tpu.memory_space<vmem>>, vector<32x1xf32>
    %11 = vector.broadcast %10 : vector<32x1xf32> to vector<32x16xf32>
    %12 = arith.addf %9, %11 : vector<32x16xf32>
    %13 = vector.extract_strided_slice %12 {offsets = [0, 0], sizes = [16, 16], strides = [1, 1]} : vector<32x16xf32> to vector<16x16xf32>
    %cst_11 = arith.constant 0.000000e+00 : f32
    %14 = vector.broadcast %cst_11 : f32 to vector<16x16xf32>
    %15 = arith.maximumf %13, %14 : vector<16x16xf32>
    %16 = vector.extract_strided_slice %12 {offsets = [16, 0], sizes = [16, 16], strides = [1, 1]} : vector<32x16xf32> to vector<16x16xf32>
    %17 = arith.addf %15, %16 : vector<16x16xf32>
    %cst_12 = arith.constant 0.000000e+00 : f32
    %18 = vector.broadcast %cst_12 : f32 to vector<16x16xf32>
    %19 = arith.maximumf %17, %18 : vector<16x16xf32>
    %c32 = arith.constant 32 : index
    %c0_13 = arith.constant 0 : index
    %20 = vector.load %arg4[%c32, %c0_13] : memref<64x64xf32, #tpu.memory_space<vmem>>, vector<16x16xf32>
    %cst_14 = arith.constant dense<0.000000e+00> : vector<16x16xf32>
    %21 = tpu.matmul %20, %19, %cst_14 {dimension_numbers = #tpu.dot_dimension_numbers<[1], [0], [0], [1], [0, 0, 1, 1], [], []>} : vector<16x16xf32>, vector<16x16xf32>, vector<16x16xf32> -> vector<16x16xf32>
    %c32_15 = arith.constant 32 : index
    %c0_16 = arith.constant 0 : index
    %22 = vector.load %arg5[%c32_15, %c0_16] : memref<64x1xf32, #tpu.memory_space<vmem>>, vector<16x1xf32>
    %23 = vector.broadcast %22 : vector<16x1xf32> to vector<16x16xf32>
    %24 = arith.addf %21, %23 : vector<16x16xf32>
    %25 = vector.extract_strided_slice %24 {offsets = [0, 0], sizes = [8, 16], strides = [1, 1]} : vector<16x16xf32> to vector<8x16xf32>
    %cst_17 = arith.constant 0.000000e+00 : f32
    %26 = vector.broadcast %cst_17 : f32 to vector<8x16xf32>
    %27 = arith.maximumf %25, %26 : vector<8x16xf32>
    %28 = vector.extract_strided_slice %24 {offsets = [8, 0], sizes = [8, 16], strides = [1, 1]} : vector<16x16xf32> to vector<8x16xf32>
    %29 = arith.addf %27, %28 : vector<8x16xf32>
    %cst_18 = arith.constant 0.000000e+00 : f32
    %30 = vector.broadcast %cst_18 : f32 to vector<8x16xf32>
    %31 = arith.maximumf %29, %30 : vector<8x16xf32>
    %c48 = arith.constant 48 : index
    %c0_19 = arith.constant 0 : index
    %32 = vector.load %arg4[%c48, %c0_19] : memref<64x64xf32, #tpu.memory_space<vmem>>, vector<16x8xf32>
    %cst_20 = arith.constant dense<0.000000e+00> : vector<16x16xf32>
    %33 = tpu.matmul %32, %31, %cst_20 {dimension_numbers = #tpu.dot_dimension_numbers<[1], [0], [0], [1], [0, 0, 1, 1], [], []>} : vector<16x8xf32>, vector<8x16xf32>, vector<16x16xf32> -> vector<16x16xf32>
    %c48_21 = arith.constant 48 : index
    %c0_22 = arith.constant 0 : index
    %34 = vector.load %arg5[%c48_21, %c0_22] : memref<64x1xf32, #tpu.memory_space<vmem>>, vector<16x1xf32>
    %35 = vector.broadcast %34 : vector<16x1xf32> to vector<16x16xf32>
    %36 = arith.addf %33, %35 : vector<16x16xf32>
    %37 = vector.extract_strided_slice %36 {offsets = [0, 0], sizes = [8, 16], strides = [1, 1]} : vector<16x16xf32> to vector<8x16xf32>
    %cst_23 = arith.constant 0.000000e+00 : f32
    %38 = vector.broadcast %cst_23 : f32 to vector<8x16xf32>
    %39 = arith.maximumf %37, %38 : vector<8x16xf32>
    %40 = vector.extract_strided_slice %36 {offsets = [8, 0], sizes = [8, 16], strides = [1, 1]} : vector<16x16xf32> to vector<8x16xf32>
    %41 = arith.addf %39, %40 : vector<8x16xf32>
    %cst_24 = arith.constant 0.000000e+00 : f32
    %42 = vector.broadcast %cst_24 : f32 to vector<8x16xf32>
    %43 = arith.maximumf %41, %42 : vector<8x16xf32>
    %cst_25 = arith.constant dense<0.000000e+00> : vector<16xf32>
    %44 = vector.multi_reduction <add>, %43, %cst_25 [0] : vector<8x16xf32> to vector<16xf32>
    %45 = vector.shape_cast %44 : vector<16xf32> to vector<1x16xf32>
    %46 = vector.shape_cast %45 : vector<1x16xf32> to vector<1x1x16xf32>
    %c0_26 = arith.constant 0 : index
    %c0_27 = arith.constant 0 : index
    %c0_28 = arith.constant 0 : index
    %47 = vector.load %arg6[%c0_26, %c0_27, %c0_28] : memref<1x1x16xf32, #tpu.memory_space<vmem>>, vector<1x1x16xf32>
    tpu.vector_store %arg6[%c0_26, %c0_27, %c0_28], %46 {strides = array<i32>} : memref<1x1x16xf32, #tpu.memory_space<vmem>>, vector<1x1x16xf32>,
    return
  }
  func.func @transform_0(%arg0: i32) -> (i32, i32) {
    %c0_i32 = arith.constant 0 : i32
    %c0_i32_0 = arith.constant 0 : i32
    return %arg0, %c0_i32 : i32, i32
  }
  func.func @transform_1(%arg0: i32) -> (i32, i32) {
    %c0_i32 = arith.constant 0 : i32
    %c0_i32_0 = arith.constant 0 : i32
    %c0_i32_1 = arith.constant 0 : i32
    return %c0_i32, %c0_i32_0 : i32, i32
  }
  func.func @transform_2(%arg0: i32) -> (i32, i32) {
    %c0_i32 = arith.constant 0 : i32
    %c0_i32_0 = arith.constant 0 : i32
    %c0_i32_1 = arith.constant 0 : i32
    return %c0_i32, %c0_i32_0 : i32, i32
  }
  func.func @transform_3(%arg0: i32) -> (i32, i32) {
    %c0_i32 = arith.constant 0 : i32
    %c0_i32_0 = arith.constant 0 : i32
    %c0_i32_1 = arith.constant 0 : i32
    return %c0_i32, %c0_i32_0 : i32, i32
  }
  func.func @transform_4(%arg0: i32) -> (i32, i32) {
    %c0_i32 = arith.constant 0 : i32
    %c0_i32_0 = arith.constant 0 : i32
    %c0_i32_1 = arith.constant 0 : i32
    return %c0_i32, %c0_i32_0 : i32, i32
  }
  func.func @transform_5(%arg0: i32) -> (i32, i32, i32) {
    %c0_i32 = arith.constant 0 : i32
    %c0_i32_0 = arith.constant 0 : i32
    %c0_i32_1 = arith.constant 0 : i32
    return %arg0, %c0_i32, %c0_i32_0 : i32, i32, i32
  }
}

</mosaic_0001>

<bundles_post_ra>
// kernel: feedforward_pallas.1
= control target key start
LH: loop header
LB: loop body
LE: loop exit
PB: predicated region body
PF: predicated region fallthrough
CT: control target
= control target key end

     0   :  { %vm45_vm0 = vcmask 1042432   ;;  %vm38_vm1 = vcmask 744448   ;;  %v281_v15 = vmov 0   ;;  %vm102_vm2 = vcmask 523264   ;;  %s417_s1 = inlined_call_operand.vmem [shape: f32[91,64], index: 1, kind: input, shape index: {}]   ;;  %s418_s2 = inlined_call_operand.vmem [shape: f32[1,64], index: 2, kind: input, shape index: {}]   ;;  %s419_s0 = inlined_call_operand.vmem [shape: f32[16,91], index: 0, kind: input, shape index: {}]   ;;  %s420_s4 = inlined_call_operand.vmem [shape: f32[64,1], index: 4, kind: input, shape index: {}]   ;;  %s421_s3 = inlined_call_operand.vmem [shape: f32[64,64], index: 3, kind: input, shape index: {}]   ;;  %s422_s5 = inlined_call_operand.vmem [shape: f32[1,1,16], index: 5, kind: output, shape index: {}]  }
   0x1   :  { %v33_v0 = vld [vmem:[%s417_s1 + $0x58] sm:$0x7]  ;;  %v32_v1 = vld [vmem:[%s417_s1 + $0x50] sm:$0xff]  ;;  %v31_v2 = vld [vmem:[%s417_s1 + $0x48] sm:$0xff]  ;;  %277 = vset.pattern.permute.xlu0 %v281_v15  ;;  %278 = vset.pattern.permute.xlu1 %v281_v15  ;;  %vm170_vm3 = vcmask 130048   ;;  %vm217_vm4 = vcmask 64512  }
   0x2   :  { %263 = vmatpush.msk.msra.mxu0 %vm45_vm0, %v33_v0  ;;  %v30_v3 = vld [vmem:[%s417_s1 + $0x40] sm:$0xff]  ;;  %v29_v4 = vld [vmem:[%s417_s1 + $0x38] sm:$0xff]  ;;  %v28_v5 = vld [vmem:[%s417_s1 + $0x30] sm:$0xff]  ;;  %279 = vset.pattern.permute.xlu2 %v281_v15  ;;  %vm257_vm5 = vcmask 122880  }
   0x3   :  { %v27_v6 = vld [vmem:[%s417_s1 + $0x28] sm:$0xff]  ;;  %v26_v7 = vld [vmem:[%s417_s1 + $0x20] sm:$0xff]  ;;  %v25_v8 = vld [vmem:[%s417_s1 + $0x18] sm:$0xff] }
   0x4   :  { %54 = vmatpush.msra.mxu0 %v32_v1  ;;  %v24_v9 = vld [vmem:[%s417_s1 + $0x10] sm:$0xff]  ;;  %v23_v10 = vld [vmem:[%s417_s1 + $0x8] sm:$0xff]  ;;  %v22_v11 = vld [vmem:[%s417_s1] sm:$0xff] }
   0x5   :  { %v20_v12 = vld [vmem:[%s419_s0] sm:$0xff]  ;;  %v21_v13 = vld [vmem:[%s419_s0 + $0x8] sm:$0xff]  ;;  %v81_v17 = vld [vmem:[%s420_s4 + $0x18] sm:$0xff] }
   0x6   :  { %55 = vmatpush.msra.mxu0 %v31_v2  ;;  %v79_v14 = vld [vmem:[%s420_s4 + $0x8] sm:$0xff]  ;;  %v78_v16 = vld [vmem:[%s420_s4] sm:$0xff]  ;;  %99 = vperm.xlu1 %278, %v81_v17   ;;  %v80_v19 = vld [vmem:[%s420_s4 + $0x10] sm:$0xff] }
   0x7   :  { %89 = vperm.xlu0 %277, %v79_v14   ;;  %v280_v20 = vld [vmem:[%s418_s2] ss:$0 sm:$0xff]  ;;  %v205_v25 = vld [vmem:[%s420_s4 + $0x30] sm:$0xff]  ;;  %v206_v26 = vld [vmem:[%s420_s4 + $0x38] sm:$0xff] }
   0x8   :  { %56 = vmatpush.msra.mxu0 %v30_v3  ;;  %v74_v28 = vld [vmem:[%s421_s3] sm:$0xff]  ;;  %v75_v29 = vld [vmem:[%s421_s3 + $0x8] sm:$0xff]  ;;  %v76_v30 = vld [vmem:[%s421_s3 + $0x10] sm:$0xff] }
   0x9   :  { %v77_v31 = vld [vmem:[%s421_s3 + $0x18] sm:$0xff]  ;;  %v158_v35 = vld [vmem:[%s420_s4 + $0x20] sm:$0xff]  ;;  %v159_v38 = vld [vmem:[%s420_s4 + $0x28] sm:$0xff] }
   0xa   :  { %57 = vmatpush.msra.mxu0 %v29_v4  ;;  %162 = vperm.xlu2 %279, %v158_v35   ;;  %v156_v52 = vld [vmem:[%s421_s3 + $0x20] sm:$0xff]  ;;  %v157_v53 = vld [vmem:[%s421_s3 + $0x28] sm:$0xff]  ;;  %v203_v63 = vld [vmem:[%s421_s3 + $0x30] sm:$0xff] }
   0xb   :  { %v204_v0 = vld [vmem:[%s421_s3 + $0x38] sm:$0xff] }
   0xc   :  { %58 = vmatpush.msra.mxu0 %v28_v5 }
   0xe   :  { %59 = vmatpush.msra.mxu0 %v27_v6  ;;  %94 = vperm.xlu1 %278, %v80_v19  }
   0xf   :  { %84 = vperm.xlu0 %277, %v78_v16  }
  0x10   :  { %60 = vmatpush.msra.mxu0 %v26_v7 }
  0x12   :  { %61 = vmatpush.msra.mxu0 %v25_v8  ;;  %167 = vperm.xlu2 %279, %v159_v38  }
  0x14   :  { %62 = vmatpush.msra.mxu0 %v24_v9 }
  0x16   :  { %63 = vmatpush.msra.mxu0 %v23_v10  ;;  %214 = vperm.xlu1 %278, %v206_v26  }
  0x17   :  { %209 = vperm.xlu0 %277, %v205_v25  }
  0x18   :  { %64 = vmatpush.msra.mxu0 %v22_v11 }
  0x19   :  { %264 = vmatmul.msk.f32.vlgmr.msra.gmra.mxu0 %vm38_vm1, %v20_v12 }
  0x21   :  { %265 = vmatmul.msk.f32.gmra.mxu0 %vm38_vm1, %v21_v13 }
  0x64   :  { %v163_v54 = vpop.permute.xlu2 %162 }
  0x6c   :  { %v168_v57 = vpop.permute.xlu2 %167 }
  0x78   :  { %v100_v36 = vpop.permute.xlu1 %99 }
  0x79   :  { %v90_v33 = vpop.permute.xlu0 %89 }
  0x80   :  { %v95_v42 = vpop.permute.xlu1 %94 }
  0x81   :  { %v85_v39 = vpop.permute.xlu0 %84 }
  0x88   :  { %v215_v4 = vpop.permute.xlu1 %214 }
  0x89   :  { %v210_v2 = vpop.permute.xlu0 %209 }
  0x96   :  { %v66_v18 = vpop.f32.mrf.mxu0 }
  0x97   :  { %v67_v23 = vadd.f32 %v280_v20, %v66_v18 }
  0x99   :  { %v72_v27 = vmax.f32 %v67_v23, 0.0 }
  0x9e   :  { %v69_v21 = vpop.f32.mrf.mxu0 }
  0x9f   :  { %v70_v22 = vadd.f32 %v280_v20, %v69_v21 }
  0xa1   :  { %v73_v24 = vmax.f32 %v70_v22, 0.0 }
  0xa3   :  { %266 = vmatpush.xpose.msk.msra.mxu1 %vm102_vm2, %v73_v24 }
  0xa7   :  { %267 = vmatpush.xpose.msk.msra.mxu1 %vm102_vm2, %v72_v27 }
  0xaa   :  { %268 = vmatmul.msk.f32.vlgmr.msra.gmra.mxu1 %vm102_vm2, %v74_v28 }
  0xb2   :  { %269 = vmatmul.msk.f32.gmra.mxu1 %vm102_vm2, %v75_v29 }
  0xba   :  { %270 = vmatmul.msk.f32.gmra.mxu1 %vm102_vm2, %v76_v30 }
  0xc2   :  { %271 = vmatmul.msk.f32.gmra.mxu1 %vm102_vm2, %v77_v31 }
 0x127   :  { %v138_v32 = vpop.f32.mrf.mxu1 }
 0x128   :  { %v139_v40 = vadd.f32 %v138_v32, %v85_v39 }
 0x12a   :  { %v150_v45 = vmax.f32 %v139_v40, 0.0 }
 0x12f   :  { %v141_v34 = vpop.f32.mrf.mxu1 }
 0x130   :  { %v142_v41 = vadd.f32 %v141_v34, %v90_v33 }
 0x132   :  { %v151_v46 = vmax.f32 %v142_v41, 0.0 }
 0x137   :  { %v144_v37 = vpop.f32.mrf.mxu1 }
 0x138   :  { %v145_v43 = vadd.f32 %v144_v37, %v95_v42 }
 0x13a   :  { %v152_v49 = vadd.f32 %v150_v45, %v145_v43 }
 0x13c   :  { %v154_v51 = vmax.f32 %v152_v49, 0.0 }
 0x13f   :  { %v147_v44 = vpop.f32.mrf.mxu1 }
 0x140   :  { %v148_v47 = vadd.f32 %v147_v44, %v100_v36 }
 0x142   :  { %v153_v48 = vadd.f32 %v151_v46, %v148_v47 }
 0x144   :  { %v155_v50 = vmax.f32 %v153_v48, 0.0 }
 0x146   :  { %191 = vmatpush.msra.mxu2 %v155_v50 }
 0x148   :  { %192 = vmatpush.msra.mxu2 %v154_v51 }
 0x149   :  { %272 = vmatmul.msk.f32.vlgmr.msra.gmra.mxu2 %vm170_vm3, %v156_v52 }
 0x151   :  { %273 = vmatmul.msk.f32.gmra.mxu2 %vm170_vm3, %v157_v53 }
 0x1cc   :  { %v194_v55 = vpop.f32.mrf.mxu2 }
 0x1cd   :  { %v195_v56 = vadd.f32 %v194_v55, %v163_v54 }
 0x1cf   :  { %v200_v59 = vmax.f32 %v195_v56, 0.0 }
 0x1d4   :  { %v197_v58 = vpop.f32.mrf.mxu2 }
 0x1d5   :  { %v198_v60 = vadd.f32 %v197_v58, %v168_v57 }
 0x1d7   :  { %v201_v61 = vadd.f32 %v200_v59, %v198_v60 }
 0x1d9   :  { %v202_v62 = vmax.f32 %v201_v61, 0.0 }
 0x1db   :  { %239 = vmatpush.msra.mxu3 %v202_v62 }
 0x1dc   :  { %274 = vmatmul.msk.f32.vlgmr.msra.gmra.mxu3 %vm217_vm4, %v203_v63 }
 0x1e4   :  { %275 = vmatmul.msk.f32.gmra.mxu3 %vm217_vm4, %v204_v0 }
 0x25f   :  { %v241_v1 = vpop.f32.mrf.mxu3 }
 0x260   :  { %v242_v3 = vadd.f32 %v241_v1, %v210_v2 }
 0x262   :  { %v247_v6 = vmax.f32 %v242_v3, 0.0 }
 0x267   :  { %v244_v5 = vpop.f32.mrf.mxu3 }
 0x268   :  { %v245_v7 = vadd.f32 %v244_v5, %v215_v4 }
 0x26a   :  { %v248_v8 = vadd.f32 %v247_v6, %v245_v7 }
 0x26c   :  { %v249_v9 = vmax.f32 %v248_v8, 0.0 }
 0x26e   :  { %v250_v10 = vsel %vm170_vm3, %v249_v9, 0.0 }
 0x26f   :  { %v251_v11 = vrot.slane %v250_v10, 4 }
 0x271   :  { %v252_v12 = vadd.f32 %v251_v11, %v250_v10 }
 0x273   :  { %v253_v13 = vrot.slane %v252_v12, 2 }
 0x275   :  { %v254_v14 = vadd.f32 %v253_v13, %v252_v12 }
 0x277   :  { %v255_v15 = vrot.slane %v254_v14, 1 }
 0x279   :  { %v256_v16 = vadd.f32 %v255_v15, %v254_v14 }
 0x27b   :  { %258 = vst.msk [vmem:[%s422_s5] sm:$0x1] %vm257_vm5, %v256_v16 }

</bundles_post_ra>
